<compile_context>
chip_gen: v6e
topology: v6e:2x2x1
jax: 0.10.0
libtpu: 0.0.40
codegen_flags: <defaults>
</compile_context>

<pallas_src>
import jax
import jax.numpy as jnp
from jax.experimental import pallas as pl
from jax.experimental.pallas import tpu as pltpu


def _round_up(x: int, m: int) -> int:
    return ((x + m - 1) // m) * m


def _mlp_kernel(x_ref, w1_ref, b1_ref, w2_ref, b2_ref, o_ref):
    # hidden = relu(x @ W1 + b1) -- bf16 operands on the MXU, f32 accumulation.
    h = jnp.dot(x_ref[...], w1_ref[...], preferred_element_type=jnp.float32)
    h = jnp.maximum(h + b1_ref[...], 0.0)
    # out = h @ W2 + b2 -- tiny second matmul kept in f32 for accuracy.
    out = jnp.dot(h, w2_ref[...], preferred_element_type=jnp.float32)
    o_ref[...] = (out + b2_ref[...]).astype(o_ref.dtype)


def _pick_batch_tile(B: int, in_pad: int, out_pad: int) -> int:
    """Biggest batch tile (multiple of 8) whose double-buffered x/out tiles fit
    well inside the default scoped-VMEM limit on all TPU generations."""
    budget = 8 * 1024 * 1024                      # ~8 MiB for the streamed tiles
    per_row = 2 * (in_pad * 2 + out_pad * 4)      # x (bf16) + out (f32), 2 buffers
    tb = max(8, (budget // per_row) // 8 * 8)
    tb = min(tb, 1024)                            # keep per-step work reasonable
    return min(tb, _round_up(max(B, 1), 8))


def logistic_model_forward(x_nchw, w1, b1, w2, b2):
    """Forward pass of LogisticModel.

    x_nchw : (B, C, H, W) float32
    w1     : (in_size, hidden)   (transposed vs PyTorch nn.Linear)
    b1     : (hidden,)
    w2     : (hidden, out_size)  (transposed vs PyTorch nn.Linear)
    b2     : (out_size,)
    returns: (B, out_size) float32
    """
    B = x_nchw.shape[0]
    in_size = w1.shape[0]
    hidden = w1.shape[1]
    out_size = w2.shape[1]

    # ---- glue: flatten NCHW -> (B, in_size), row-major (matches torch .view) ----
    x = x_nchw.reshape(B, in_size).astype(jnp.float32)

    # ---- lane/sublane padding (zeros -> numerics of real rows/cols unchanged) ----
    in_pad = _round_up(in_size, 128)
    hid_pad = _round_up(hidden, 128)
    out_pad = _round_up(out_size, 128)

    TB = _pick_batch_tile(B, in_pad, out_pad)
    B_pad = _round_up(max(B, 1), TB)
    n_tiles = B_pad // TB

    # x, W1 in bf16 (halves HBM traffic for the only sizeable operands; MXU runs
    # native bf16).  Everything downstream stays f32.
    x_p = jnp.pad(x.astype(jnp.bfloat16),
                  ((0, B_pad - B), (0, in_pad - in_size)))
    w1_p = jnp.pad(w1.astype(jnp.bfloat16),
                   ((0, in_pad - in_size), (0, hid_pad - hidden)))
    b1_p = jnp.pad(b1.astype(jnp.float32).reshape(1, hidden),
                   ((0, 0), (0, hid_pad - hidden)))
    w2_p = jnp.pad(w2.astype(jnp.float32),
                   ((0, hid_pad - hidden), (0, out_pad - out_size)))
    b2_p = jnp.pad(b2.astype(jnp.float32).reshape(1, out_size),
                   ((0, 0), (0, out_pad - out_size)))

    cost = pl.CostEstimate(
        flops=2 * B_pad * in_pad * hid_pad + 2 * B_pad * hid_pad * out_pad,
        transcendentals=0,
        bytes_accessed=(x_p.size * 2 + w1_p.size * 2
                        + (b1_p.size + w2_p.size + b2_p.size) * 4
                        + B_pad * out_pad * 4),
    )

    out_padded = pl.pallas_call(
        _mlp_kernel,
        out_shape=jax.ShapeDtypeStruct((B_pad, out_pad), jnp.float32),
        grid_spec=pltpu.PrefetchScalarGridSpec(
            num_scalar_prefetch=0,
            grid=(n_tiles,),
            in_specs=[
                # x tile marches over the batch; weights/biases stay resident.
                pl.BlockSpec((TB, in_pad), lambda i: (i, 0)),
                pl.BlockSpec((in_pad, hid_pad), lambda i: (0, 0)),
                pl.BlockSpec((1, hid_pad), lambda i: (0, 0)),
                pl.BlockSpec((hid_pad, out_pad), lambda i: (0, 0)),
                pl.BlockSpec((1, out_pad), lambda i: (0, 0)),
            ],
            out_specs=pl.BlockSpec((TB, out_pad), lambda i: (i, 0)),
        ),
        compiler_params=pltpu.CompilerParams(
            dimension_semantics=("parallel",)),
        cost_estimate=cost,
    )(x_p, w1_p, b1_p, w2_p, b2_p)

    # Strip batch/lane padding.
    return out_padded[:B, :out_size]


def init_params(key, in_size, hidden_size, out_size):
    """Deterministic init mimicking nn.Linear default (uniform +/- 1/sqrt(fan_in))."""
    k1, k2, k3, k4 = jax.random.split(key, 4)
    bound1 = 1.0 / jnp.sqrt(in_size)
    bound2 = 1.0 / jnp.sqrt(hidden_size)
    w1 = jax.random.uniform(k1, (in_size, hidden_size), jnp.float32,
                            minval=-bound1, maxval=bound1)
    b1 = jax.random.uniform(k2, (hidden_size,), jnp.float32,
                            minval=-bound1, maxval=bound1)
    w2 = jax.random.uniform(k3, (hidden_size, out_size), jnp.float32,
                            minval=-bound2, maxval=bound2)
    b2 = jax.random.uniform(k4, (out_size,), jnp.float32,
                            minval=-bound2, maxval=bound2)
    return w1, b1, w2, b2


if __name__ == "__main__":
    # Small shapes consistent with the module: image batch flattened into in_size.
    B, C, H, W = 2, 4, 16, 16
    in_size = C * H * W          # 1024
    hidden_size = 32
    out_size = 10

    key = jax.random.PRNGKey(0)
    kx, kp = jax.random.split(key)
    x = jax.random.normal(kx, (B, C, H, W), jnp.float32)
    w1, b1, w2, b2 = init_params(kp, in_size, hidden_size, out_size)

    out = logistic_model_forward(x, w1, b1, w2, b2)
    out = jax.block_until_ready(out)
    assert out.shape == (B, out_size)

    # Reference 1: same bf16-input / f32-accumulation recipe as the kernel (tight).
    x_flat = x.reshape(B, -1)
    h_bf = jnp.dot(x_flat.astype(jnp.bfloat16), w1.astype(jnp.bfloat16),
                   preferred_element_type=jnp.float32)
    ref_bf16 = jnp.maximum(h_bf + b1, 0.0) @ w2 + b2
    assert jnp.allclose(out, ref_bf16, atol=1e-3, rtol=1e-3)

    # Reference 2: full-f32 PyTorch-equivalent forward (loose, bf16 input drift).
    ref_f32 = jnp.maximum(x_flat @ w1 + b1, 0.0) @ w2 + b2
    assert jnp.allclose(out, ref_f32, atol=5e-2, rtol=5e-2)

    print("KERNEL_OK")
</pallas_src>

<mosaic_0001>
module attributes {stable_mosaic.version = 11 : i64} {
  func.func @_mlp_kernel(%arg0: i32, %arg1: memref<8x1024xbf16, #tpu.memory_space<vmem>>, %arg2: memref<1024x128xbf16, #tpu.memory_space<vmem>>, %arg3: memref<1x128xf32, #tpu.memory_space<vmem>>, %arg4: memref<128x128xf32, #tpu.memory_space<vmem>>, %arg5: memref<1x128xf32, #tpu.memory_space<vmem>>, %arg6: memref<8x128xf32, #tpu.memory_space<vmem>>) attributes {dimension_semantics = [#tpu.dimension_semantics<parallel>], iteration_bounds = array<i64: 1>, scalar_prefetch = 0 : i64, scratch_operands = 0 : i64, tpu.core_type = #tpu.core_type<tc>, window_params = [{transform_indices = @transform_0, window_bounds = array<i64: 8, 1024>}, {pipeline_mode = #tpu.pipeline_mode<synchronous>, transform_indices = @transform_1, window_bounds = array<i64: 1024, 128>}, {pipeline_mode = #tpu.pipeline_mode<synchronous>, transform_indices = @transform_2, window_bounds = array<i64: 1, 128>}, {pipeline_mode = #tpu.pipeline_mode<synchronous>, transform_indices = @transform_3, window_bounds = array<i64: 128, 128>}, {pipeline_mode = #tpu.pipeline_mode<synchronous>, transform_indices = @transform_4, window_bounds = array<i64: 1, 128>}, {transform_indices = @transform_5, window_bounds = array<i64: 8, 128>}]} {
    %c0 = arith.constant 0 : index
    %c0_0 = arith.constant 0 : index
    %0 = vector.load %arg1[%c0, %c0_0] : memref<8x1024xbf16, #tpu.memory_space<vmem>>, vector<8x1024xbf16>
    %c0_1 = arith.constant 0 : index
    %c0_2 = arith.constant 0 : index
    %1 = vector.load %arg2[%c0_1, %c0_2] : memref<1024x128xbf16, #tpu.memory_space<vmem>>, vector<1024x128xbf16>
    %cst = arith.constant dense<0.000000e+00> : vector<8x128xf32>
    %2 = tpu.matmul %0, %1, %cst {dimension_numbers = #tpu.dot_dimension_numbers<[1], [0], [0], [1], [0, 0, 1, 1], [], []>} : vector<8x1024xbf16>, vector<1024x128xbf16>, vector<8x128xf32> -> vector<8x128xf32>
    %c0_3 = arith.constant 0 : index
    %c0_4 = arith.constant 0 : index
    %3 = vector.load %arg3[%c0_3, %c0_4] : memref<1x128xf32, #tpu.memory_space<vmem>>, vector<1x128xf32>
    %4 = vector.broadcast %3 : vector<1x128xf32> to vector<8x128xf32>
    %5 = arith.addf %2, %4 : vector<8x128xf32>
    %cst_5 = arith.constant 0.000000e+00 : f32
    %6 = vector.broadcast %cst_5 : f32 to vector<8x128xf32>
    %7 = arith.maximumf %5, %6 : vector<8x128xf32>
    %c0_6 = arith.constant 0 : index
    %c0_7 = arith.constant 0 : index
    %8 = vector.load %arg4[%c0_6, %c0_7] : memref<128x128xf32, #tpu.memory_space<vmem>>, vector<128x128xf32>
    %cst_8 = arith.constant dense<0.000000e+00> : vector<8x128xf32>
    %9 = tpu.matmul %7, %8, %cst_8 {dimension_numbers = #tpu.dot_dimension_numbers<[1], [0], [0], [1], [0, 0, 1, 1], [], []>} : vector<8x128xf32>, vector<128x128xf32>, vector<8x128xf32> -> vector<8x128xf32>
    %c0_9 = arith.constant 0 : index
    %c0_10 = arith.constant 0 : index
    %10 = vector.load %arg5[%c0_9, %c0_10] : memref<1x128xf32, #tpu.memory_space<vmem>>, vector<1x128xf32>
    %11 = vector.broadcast %10 : vector<1x128xf32> to vector<8x128xf32>
    %12 = arith.addf %9, %11 : vector<8x128xf32>
    %c0_11 = arith.constant 0 : index
    %c0_12 = arith.constant 0 : index
    %13 = vector.load %arg6[%c0_11, %c0_12] : memref<8x128xf32, #tpu.memory_space<vmem>>, vector<8x128xf32>
    tpu.vector_store %arg6[%c0_11, %c0_12], %12 {strides = array<i32>} : memref<8x128xf32, #tpu.memory_space<vmem>>, vector<8x128xf32>,
    return
  }
  func.func @transform_0(%arg0: i32) -> (i32, i32) {
    %c0_i32 = arith.constant 0 : i32
    %c0_i32_0 = arith.constant 0 : i32
    return %arg0, %c0_i32 : i32, i32
  }
  func.func @transform_1(%arg0: i32) -> (i32, i32) {
    %c0_i32 = arith.constant 0 : i32
    %c0_i32_0 = arith.constant 0 : i32
    %c0_i32_1 = arith.constant 0 : i32
    return %c0_i32, %c0_i32_0 : i32, i32
  }
  func.func @transform_2(%arg0: i32) -> (i32, i32) {
    %c0_i32 = arith.constant 0 : i32
    %c0_i32_0 = arith.constant 0 : i32
    %c0_i32_1 = arith.constant 0 : i32
    return %c0_i32, %c0_i32_0 : i32, i32
  }
  func.func @transform_3(%arg0: i32) -> (i32, i32) {
    %c0_i32 = arith.constant 0 : i32
    %c0_i32_0 = arith.constant 0 : i32
    %c0_i32_1 = arith.constant 0 : i32
    return %c0_i32, %c0_i32_0 : i32, i32
  }
  func.func @transform_4(%arg0: i32) -> (i32, i32) {
    %c0_i32 = arith.constant 0 : i32
    %c0_i32_0 = arith.constant 0 : i32
    %c0_i32_1 = arith.constant 0 : i32
    return %c0_i32, %c0_i32_0 : i32, i32
  }
  func.func @transform_5(%arg0: i32) -> (i32, i32) {
    %c0_i32 = arith.constant 0 : i32
    %c0_i32_0 = arith.constant 0 : i32
    return %arg0, %c0_i32 : i32, i32
  }
}

</mosaic_0001>

<bundles_post_ra>
// kernel: tpu_custom_call.1
= control target key start
LH: loop header
LB: loop body
LE: loop exit
PB: predicated region body
PF: predicated region fallthrough
CT: control target
= control target key end

     0   :  { %10 = vsyncpa [#allocation3], 0  ;;  %s1323_s0 = inlined_call_operand.hbm [shape: bf16[8,1024], index: 0, kind: input, shape index: {}]   ;;  %s1324_s1 = inlined_call_operand.hbm [shape: bf16[1024,128], index: 1, kind: input, shape index: {}]   ;;  %s1325_s2 = inlined_call_operand.vmem [shape: f32[1,128], index: 2, kind: input, shape index: {}]   ;;  %s1326_s3 = inlined_call_operand.hbm [shape: f32[128,128], index: 3, kind: input, shape index: {}]   ;;  %s1327_s4 = inlined_call_operand.vmem [shape: f32[1,128], index: 4, kind: input, shape index: {}]   ;;  %s1328_s5 = inlined_call_operand.hbm [shape: f32[8,128], index: 5, kind: output, shape index: {}]  }
   0x1   :  { %11 = vsyncpa [#allocation6], 0 }
   0x2   :  { %12 = vsyncpa [#allocation4], 0  ;;  %s1265_s18 = smov [#allocation5]  }
   0x3   :  { %s28_s19 = sshll.u32 %s1265_s18, 4  ;;  %s29_s19 = int_to_ptr.vmem [resolvable:$true] %s28_s19 }
   0x4   :  { %s1187_s20 = scalar_lea.vmem %s29_s19, 8192  ;;  %p1192_p1 = scmp.lt.s32.totalorder %s29_s19, %s29_s19 }
   0x5   :  { %p1188_p0 = scmp.ne.s32.totalorder %s29_s19, %s1187_s20  ;;  %p1193_p2 = scmp.lt.s32.totalorder %s1187_s20, %s1187_s20 }
   0x7   :  { %p1194_p3 = por %p1193_p2, %p1192_p1 }
   0x9   :  { %p1195_p4 = pnand %p1194_p3, %p1188_p0 }
   0xb   :  { %1198 = shalt.err (!%p1195_p4)
}
   0xc   :  { %s1266_s21 = smov 64   ;;  %s1267_s22 = smov 4  }
   0xd   :  { %34 = dma.hbm_to_vmem [thread:$0]  %s1324_s1, 8192, %s29_s19, [#allocation6], %s1266_s21, %s1266_s21, %s1267_s22  }
   0xe   :  { %s1268_s25 = smov [#allocation2]   ;;  %s1269_s27 = smov [#allocation7]  }
   0xf   :  { %s19_s26 = sshll.u32 %s1268_s25, 4  ;;  %s42_s28 = sshll.u32 %s1269_s27, 4  ;;  %s20_s26 = int_to_ptr.vmem [resolvable:$true] %s19_s26  ;;  %s43_s28 = int_to_ptr.vmem [resolvable:$true] %s42_s28 }
  0x10   :  { %s1207_s29 = scalar_lea.vmem %s20_s26, 512  ;;  %p1212_p6 = scmp.lt.s32.totalorder %s20_s26, %s20_s26 }
  0x11   :  { %p1208_p5 = scmp.ne.s32.totalorder %s20_s26, %s1207_s29  ;;  %p1213_p7 = scmp.lt.s32.totalorder %s1207_s29, %s1207_s29 }
  0x13   :  { %p1214_p8 = por %p1213_p7, %p1212_p6 }
  0x15   :  { %p1215_p9 = pnand %p1214_p8, %p1208_p5 }
  0x17   :  { %1218 = shalt.err (!%p1215_p9)
}
  0x18   :  { %22 = dma.hbm_to_vmem [thread:$0]  %s1323_s0, 512, %s20_s26, [#allocation3]  }
  0x19   :  { %s1227_s7 = scalar_lea.vmem %s43_s28, 2048  ;;  %p1232_p11 = scmp.lt.s32.totalorder %s43_s28, %s43_s28 }
  0x1a   :  { %p1228_p10 = scmp.ne.s32.totalorder %s43_s28, %s1227_s7  ;;  %p1233_p12 = scmp.lt.s32.totalorder %s1227_s7, %s1227_s7 }
  0x1c   :  { %p1234_p13 = por %p1233_p12, %p1232_p11 }
  0x1e   :  { %p1235_p0 = pnand %p1234_p13, %p1228_p10 }
  0x20   :  { %1238 = shalt.err (!%p1235_p0)
}
  0x21   :  { %s1270_s1 = smov 128   ;;  %s1271_s8 = smov 8  }
  0x22   :  { %48 = dma.hbm_to_vmem [thread:$0]  %s1326_s3, 2048, %s43_s28, [#allocation6], %s1270_s1, %s1270_s1, %s1271_s8  }
  0x23   :  { %1259 = dma.done.wait [#allocation3], 512  }
  0x24   :  { %1260 = vsyncadd [#allocation3], 4294966784 }
  0x25   :  { %1261 = dma.done.wait [#allocation6], 10240  }
  0x26   :  { %1262 = vsyncadd [#allocation6], 4294957056  ;;  %v1107_v0 = vld [vmem:[#allocation5 + $0x78] sm:$0xff]   ;;  %v1111_v4 = vld [vmem:[#allocation5 + $0x70] sm:$0xff]   ;;  %vm1273_vm0 = vmmov 0  }
  0x27   :  { %v1108_v1 = vld [vmem:[#allocation5 + $0xf8] sm:$0xff]   ;;  %957 = vmatprep.subr.bf16.mxu0 %v1107_v0  ;;  %v1112_v5 = vld [vmem:[#allocation5 + $0xf0] sm:$0xff]   ;;  %v1115_v8 = vld [vmem:[#allocation5 + $0x68] sm:$0xff]  }
  0x28   :  { %v1109_v2 = vld [vmem:[#allocation5 + $0x38] sm:$0xff]   ;;  %979 = vmatprep.subr.bf16.mxu1 %v1108_v1  ;;  %v1113_v6 = vld [vmem:[#allocation5 + $0x30] sm:$0xff]   ;;  %v1116_v9 = vld [vmem:[#allocation5 + $0xe8] sm:$0xff]  }
  0x29   :  { %v1110_v3 = vld [vmem:[#allocation5 + $0xb8] sm:$0xff]   ;;  %958 = vmatpush3.bf16.msra.mxu0 %v1109_v2  ;;  %v1114_v7 = vld [vmem:[#allocation5 + $0xb0] sm:$0xff]   ;;  %v1117_v10 = vld [vmem:[#allocation5 + $0x28] sm:$0xff]  }
  0x2a   :  { %980 = vmatpush3.bf16.msra.mxu1 %v1110_v3  ;;  %959 = vmatprep.subr.bf16.mxu0 %v1111_v4  ;;  %v1118_v11 = vld [vmem:[#allocation5 + $0xa8] sm:$0xff]   ;;  %v1119_v12 = vld [vmem:[#allocation5 + $0x60] sm:$0xff]   ;;  %v1123_v16 = vld [vmem:[#allocation5 + $0x58] sm:$0xff]  }
  0x2b   :  { %981 = vmatprep.subr.bf16.mxu1 %v1112_v5  ;;  %v1120_v13 = vld [vmem:[#allocation5 + $0xe0] sm:$0xff]   ;;  %v1124_v17 = vld [vmem:[#allocation5 + $0xd8] sm:$0xff]   ;;  %v1127_v20 = vld [vmem:[#allocation5 + $0x50] sm:$0xff]  }
  0x2c   :  { %v1121_v14 = vld [vmem:[#allocation5 + $0x20] sm:$0xff]   ;;  %v1125_v18 = vld [vmem:[#allocation5 + $0x18] sm:$0xff]   ;;  %v1128_v21 = vld [vmem:[#allocation5 + $0xd0] sm:$0xff]  }
  0x2d   :  { %960 = vmatpush3.bf16.msra.mxu0 %v1113_v6  ;;  %v1122_v15 = vld [vmem:[#allocation5 + $0xa0] sm:$0xff]   ;;  %v1126_v19 = vld [vmem:[#allocation5 + $0x98] sm:$0xff]   ;;  %v1129_v22 = vld [vmem:[#allocation5 + $0x10] sm:$0xff]  }
  0x2e   :  { %982 = vmatpush3.bf16.msra.mxu1 %v1114_v7  ;;  %961 = vmatprep.subr.bf16.mxu0 %v1115_v8  ;;  %v1130_v23 = vld [vmem:[#allocation5 + $0x90] sm:$0xff]   ;;  %v1131_v24 = vld [vmem:[#allocation5 + $0x48] sm:$0xff]   ;;  %v1135_v28 = vld [vmem:[#allocation5 + $0x40] sm:$0xff]  }
  0x2f   :  { %983 = vmatprep.subr.bf16.mxu1 %v1116_v9  ;;  %v1132_v25 = vld [vmem:[#allocation5 + $0xc8] sm:$0xff]   ;;  %v1136_v29 = vld [vmem:[#allocation5 + $0xc0] sm:$0xff]   ;;  %v1143_v38 = vld [vmem:[#allocation5 + $0x178] sm:$0xff]  }
  0x30   :  { %v1133_v26 = vld [vmem:[#allocation5 + $0x8] sm:$0xff]   ;;  %v1137_v30 = vld [vmem:[#allocation5] sm:$0xff]   ;;  %v1144_v39 = vld [vmem:[#allocation5 + $0x1f8] sm:$0xff]  }
  0x31   :  { %962 = vmatpush3.bf16.msra.mxu0 %v1117_v10  ;;  %v1134_v27 = vld [vmem:[#allocation5 + $0x88] sm:$0xff]   ;;  %v1138_v31 = vld [vmem:[#allocation5 + $0x80] sm:$0xff]   ;;  %v1145_v40 = vld [vmem:[#allocation5 + $0x138] sm:$0xff]  }
  0x32   :  { %984 = vmatpush3.bf16.msra.mxu1 %v1118_v11  ;;  %963 = vmatprep.subr.bf16.mxu0 %v1119_v12  ;;  %v61_v32 = vld [vmem:[#allocation2] sm:$0xff]  ;;  %v62_v33 = vld [vmem:[#allocation2 + $0x8] sm:$0xff]  ;;  %v1146_v41 = vld [vmem:[#allocation5 + $0x1b8] sm:$0xff]  }
  0x33   :  { %985 = vmatprep.subr.bf16.mxu1 %v1120_v13  ;;  %v884_v34 = vcombine.low %v61_v32, %v61_v32  ;;  %v885_v35 = vcombine.high %v61_v32, %v61_v32  ;;  %v886_v36 = vcombine.low %v62_v33, %v62_v33  ;;  %v887_v37 = vcombine.high %v62_v33, %v62_v33  ;;  %v1147_v42 = vld [vmem:[#allocation5 + $0x170] sm:$0xff]   ;;  %v1151_v46 = vld [vmem:[#allocation5 + $0x168] sm:$0xff]   ;;  %v1155_v50 = vld [vmem:[#allocation5 + $0x160] sm:$0xff]  }
  0x34   :  { %v1148_v43 = vld [vmem:[#allocation5 + $0x1f0] sm:$0xff]   ;;  %v1152_v47 = vld [vmem:[#allocation5 + $0x1e8] sm:$0xff]   ;;  %v1156_v51 = vld [vmem:[#allocation5 + $0x1e0] sm:$0xff]   ;;  %v1272_v13 = vmov 0.0  }
  0x35   :  { %964 = vmatpush3.bf16.msra.mxu0 %v1121_v14  ;;  %644 = vmatprep.mubr.bf16.mxu0 %v885_v35  ;;  %v1149_v44 = vld [vmem:[#allocation5 + $0x130] sm:$0xff]   ;;  %v1153_v48 = vld [vmem:[#allocation5 + $0x128] sm:$0xff]   ;;  %v1157_v52 = vld [vmem:[#allocation5 + $0x120] sm:$0xff]  }
  0x36   :  { %986 = vmatpush3.bf16.msra.mxu1 %v1122_v15  ;;  %965 = vmatprep.subr.bf16.mxu0 %v1123_v16  ;;  %v1150_v45 = vld [vmem:[#allocation5 + $0x1b0] sm:$0xff]   ;;  %v1154_v49 = vld [vmem:[#allocation5 + $0x1a8] sm:$0xff]   ;;  %v1158_v53 = vld [vmem:[#allocation5 + $0x1a0] sm:$0xff]  }
  0x37   :  { %987 = vmatprep.subr.bf16.mxu1 %v1124_v17  ;;  %684 = vmatprep.mubr.bf16.mxu1 %v887_v37  ;;  %v1159_v54 = vld [vmem:[#allocation5 + $0x158] sm:$0xff]   ;;  %v1163_v58 = vld [vmem:[#allocation5 + $0x150] sm:$0xff]   ;;  %v1167_v62 = vld [vmem:[#allocation5 + $0x148] sm:$0xff]  }
  0x38   :  { %v1160_v55 = vld [vmem:[#allocation5 + $0x1d8] sm:$0xff]   ;;  %v1164_v59 = vld [vmem:[#allocation5 + $0x1d0] sm:$0xff]   ;;  %v1168_v63 = vld [vmem:[#allocation5 + $0x1c8] sm:$0xff]  }
  0x39   :  { %966 = vmatpush3.bf16.msra.mxu0 %v1125_v18  ;;  %v1161_v56 = vld [vmem:[#allocation5 + $0x118] sm:$0xff]   ;;  %v1165_v60 = vld [vmem:[#allocation5 + $0x110] sm:$0xff]   ;;  %v1169_v0 = vld [vmem:[#allocation5 + $0x108] sm:$0xff]  }
  0x3a   :  { %988 = vmatpush3.bf16.msra.mxu1 %v1126_v19  ;;  %967 = vmatprep.subr.bf16.mxu0 %v1127_v20  ;;  %v1162_v57 = vld [vmem:[#allocation5 + $0x198] sm:$0xff]   ;;  %v1166_v61 = vld [vmem:[#allocation5 + $0x190] sm:$0xff]   ;;  %v1170_v1 = vld [vmem:[#allocation5 + $0x188] sm:$0xff]  }
  0x3b   :  { %989 = vmatprep.subr.bf16.mxu1 %v1128_v21  ;;  %v1171_v2 = vld [vmem:[#allocation5 + $0x140] sm:$0xff]   ;;  %v63_v6 = vld [vmem:[#allocation2 + $0x10] sm:$0xff]  ;;  %v64_v9 = vld [vmem:[#allocation2 + $0x18] sm:$0xff] }
  0x3c   :  { %v1172_v3 = vld [vmem:[#allocation5 + $0x1c0] sm:$0xff]   ;;  %v888_v7 = vcombine.low %v63_v6, %v63_v6  ;;  %v889_v8 = vcombine.high %v63_v6, %v63_v6  ;;  %v890_v10 = vcombine.low %v64_v9, %v64_v9  ;;  %v891_v11 = vcombine.high %v64_v9, %v64_v9  ;;  %v788_v12 = vld [vmem:[#allocation7 + $0x78] sm:$0xff]  ;;  %v787_v14 = vld [vmem:[#allocation7 + $0x70] sm:$0xff] }
  0x3d   :  { %968 = vmatpush3.bf16.msra.mxu0 %v1129_v22  ;;  %v1173_v4 = vld [vmem:[#allocation5 + $0x100] sm:$0xff]   ;;  %v786_v15 = vld [vmem:[#allocation7 + $0x68] sm:$0xff]  ;;  %v784_v17 = vld [vmem:[#allocation7 + $0x58] sm:$0xff] }
  0x3e   :  { %990 = vmatpush3.bf16.msra.mxu1 %v1130_v23  ;;  %969 = vmatprep.subr.bf16.mxu0 %v1131_v24  ;;  %v1174_v5 = vld [vmem:[#allocation5 + $0x180] sm:$0xff]   ;;  %v783_v18 = vld [vmem:[#allocation7 + $0x50] sm:$0xff]  ;;  %v782_v19 = vld [vmem:[#allocation7 + $0x48] sm:$0xff] }
  0x3f   :  { %991 = vmatprep.subr.bf16.mxu1 %v1132_v25  ;;  %v785_v16 = vld [vmem:[#allocation7 + $0x60] sm:$0xff]  ;;  %v780_v21 = vld [vmem:[#allocation7 + $0x38] sm:$0xff]  ;;  %v779_v22 = vld [vmem:[#allocation7 + $0x30] sm:$0xff] }
  0x40   :  { %v781_v20 = vld [vmem:[#allocation7 + $0x40] sm:$0xff]  ;;  %v778_v23 = vld [vmem:[#allocation7 + $0x28] sm:$0xff]  ;;  %v776_v25 = vld [vmem:[#allocation7 + $0x18] sm:$0xff] }
  0x41   :  { %970 = vmatpush3.bf16.msra.mxu0 %v1133_v26  ;;  %v777_v24 = vld [vmem:[#allocation7 + $0x20] sm:$0xff]  ;;  %v775_v26 = vld [vmem:[#allocation7 + $0x10] sm:$0xff] }
  0x42   :  { %992 = vmatpush3.bf16.msra.mxu1 %v1134_v27  ;;  %971 = vmatprep.subr.bf16.mxu0 %v1135_v28  ;;  %v774_v27 = vld [vmem:[#allocation7 + $0x8] sm:$0xff]  ;;  %v773_v28 = vld [vmem:[#allocation7] sm:$0xff] }
  0x43   :  { %993 = vmatprep.subr.bf16.mxu1 %v1136_v29 }
  0x45   :  { %972 = vmatpush3.bf16.msra.mxu0 %v1137_v30 }
  0x46   :  { %994 = vmatpush3.bf16.msra.mxu1 %v1138_v31  ;;  %1001 = vmatprep.subr.bf16.mxu0 %v1143_v38  ;;  %v883_v38 = vld [vmem:[%s1325_s2] ss:$0 sm:$0xff]  ;;  %s1274_s2 = smov [#allocation8]  }
  0x47   :  { %1023 = vmatprep.subr.bf16.mxu1 %v1144_v39  ;;  %s873_s13 = sshll.u32 %s1274_s2, 4  ;;  %s874_s13 = int_to_ptr.vmem [resolvable:$true] %s873_s13 }
  0x48   :  { %645 = vmatmul.mubr.bf16.vlgmr.msra.gmra.mxu0 %v884_v34  ;;  %s1239_s14 = scalar_lea.vmem %s874_s13, 128  ;;  %p1244_p2 = scmp.lt.s32.totalorder %s874_s13, %s874_s13 }
  0x49   :  { %685 = vmatmul.mubr.bf16.vlgmr.msra.gmra.mxu1 %v886_v36  ;;  %1002 = vmatpush3.bf16.msra.mxu0 %v1145_v40  ;;  %p1240_p1 = scmp.ne.s32.totalorder %s874_s13, %s1239_s14  ;;  %p1245_p3 = scmp.lt.s32.totalorder %s1239_s14, %s1239_s14 }
  0x4a   :  { %1024 = vmatpush3.bf16.msra.mxu1 %v1146_v41  ;;  %1003 = vmatprep.subr.bf16.mxu0 %v1147_v42 }
  0x4b   :  { %1025 = vmatprep.subr.bf16.mxu1 %v1148_v43  ;;  %724 = vmatprep.mubr.bf16.mxu0 %v889_v8  ;;  %p1246_p4 = por %p1245_p3, %p1244_p2 }
  0x4c   :  { %764 = vmatprep.mubr.bf16.mxu1 %v891_v11 }
  0x4d   :  { %1004 = vmatpush3.bf16.msra.mxu0 %v1149_v44  ;;  %p1247_p5 = pnand %p1246_p4, %p1240_p1 }
  0x4e   :  { %1026 = vmatpush3.bf16.msra.mxu1 %v1150_v45  ;;  %1005 = vmatprep.subr.bf16.mxu0 %v1151_v46 }
  0x4f   :  { %1027 = vmatprep.subr.bf16.mxu1 %v1152_v47 }
  0x51   :  { %1006 = vmatpush3.bf16.msra.mxu0 %v1153_v48 }
  0x52   :  { %1028 = vmatpush3.bf16.msra.mxu1 %v1154_v49  ;;  %1007 = vmatprep.subr.bf16.mxu0 %v1155_v50 }
  0x53   :  { %1029 = vmatprep.subr.bf16.mxu1 %v1156_v51 }
  0x55   :  { %1008 = vmatpush3.bf16.msra.mxu0 %v1157_v52 }
  0x56   :  { %1030 = vmatpush3.bf16.msra.mxu1 %v1158_v53  ;;  %1009 = vmatprep.subr.bf16.mxu0 %v1159_v54 }
  0x57   :  { %1031 = vmatprep.subr.bf16.mxu1 %v1160_v55  ;;  %v956_v55 = vld [vmem:[%s1327_s4] ss:$0 sm:$0xff] }
  0x59   :  { %1010 = vmatpush3.bf16.msra.mxu0 %v1161_v56 }
  0x5a   :  { %1032 = vmatpush3.bf16.msra.mxu1 %v1162_v57  ;;  %1011 = vmatprep.subr.bf16.mxu0 %v1163_v58 }
  0x5b   :  { %1033 = vmatprep.subr.bf16.mxu1 %v1164_v59 }
  0x5d   :  { %1012 = vmatpush3.bf16.msra.mxu0 %v1165_v60 }
  0x5e   :  { %1034 = vmatpush3.bf16.msra.mxu1 %v1166_v61  ;;  %1013 = vmatprep.subr.bf16.mxu0 %v1167_v62 }
  0x5f   :  { %1035 = vmatprep.subr.bf16.mxu1 %v1168_v63 }
  0x61   :  { %1014 = vmatpush3.bf16.msra.mxu0 %v1169_v0 }
  0x62   :  { %1036 = vmatpush3.bf16.msra.mxu1 %v1170_v1  ;;  %1015 = vmatprep.subr.bf16.mxu0 %v1171_v2 }
  0x63   :  { %1037 = vmatprep.subr.bf16.mxu1 %v1172_v3 }
  0x65   :  { %1016 = vmatpush3.bf16.msra.mxu0 %v1173_v4 }
  0x66   :  { %1038 = vmatpush3.bf16.msra.mxu1 %v1174_v5  ;;  %1062 = vmatprep.subr.mxu0 %v1272_v13 }
  0x68   :  { %725 = vmatmul.mubr.bf16.vlgmr.msra.gmra.mxu0 %v888_v7 }
  0x69   :  { %765 = vmatmul.mubr.bf16.vlgmr.msra.gmra.mxu1 %v890_v10  ;;  %1063 = vmatpush3.msra.mxu0 %v788_v12 }
  0x6a   :  { %1064 = vmatprep.subr.mxu0 %v1272_v13  ;;  %1094 = vmatprep.mubr.msk.f32.mxu0 %vm1273_vm0, %v1272_v13 }
  0x6b   :  { %1065 = vmatpush3.msra.mxu0 %v787_v14 }
  0x6c   :  { %1066 = vmatprep.subr.mxu0 %v1272_v13 }
  0x6d   :  { %1067 = vmatpush3.msra.mxu0 %v786_v15 }
  0x6e   :  { %1068 = vmatprep.subr.mxu0 %v1272_v13 }
  0x6f   :  { %1069 = vmatpush3.msra.mxu0 %v785_v16 }
  0x70   :  { %1070 = vmatprep.subr.mxu0 %v1272_v13 }
  0x71   :  { %1071 = vmatpush3.msra.mxu0 %v784_v17 }
  0x72   :  { %1072 = vmatprep.subr.mxu0 %v1272_v13 }
  0x73   :  { %1073 = vmatpush3.msra.mxu0 %v783_v18 }
  0x74   :  { %1074 = vmatprep.subr.mxu0 %v1272_v13 }
  0x75   :  { %1075 = vmatpush3.msra.mxu0 %v782_v19 }
  0x76   :  { %1076 = vmatprep.subr.mxu0 %v1272_v13 }
  0x77   :  { %1077 = vmatpush3.msra.mxu0 %v781_v20 }
  0x78   :  { %1078 = vmatprep.subr.mxu0 %v1272_v13 }
  0x79   :  { %1079 = vmatpush3.msra.mxu0 %v780_v21 }
  0x7a   :  { %1080 = vmatprep.subr.mxu0 %v1272_v13 }
  0x7b   :  { %1081 = vmatpush3.msra.mxu0 %v779_v22 }
  0x7c   :  { %1082 = vmatprep.subr.mxu0 %v1272_v13 }
  0x7d   :  { %1083 = vmatpush3.msra.mxu0 %v778_v23 }
  0x7e   :  { %1084 = vmatprep.subr.mxu0 %v1272_v13 }
  0x7f   :  { %1085 = vmatpush3.msra.mxu0 %v777_v24 }
  0x80   :  { %1086 = vmatprep.subr.mxu0 %v1272_v13 }
  0x81   :  { %1087 = vmatpush3.msra.mxu0 %v776_v25 }
  0x82   :  { %1088 = vmatprep.subr.mxu0 %v1272_v13 }
  0x83   :  { %1089 = vmatpush3.msra.mxu0 %v775_v26 }
  0x84   :  { %1090 = vmatprep.subr.mxu0 %v1272_v13 }
  0x85   :  { %1091 = vmatpush3.msra.mxu0 %v774_v27 }
  0x86   :  { %1092 = vmatprep.subr.mxu0 %v1272_v13 }
  0x87   :  { %1093 = vmatpush3.msra.mxu0 %v773_v28 }
 0x108   :  { %v973_v29 = vpop.f32.mrf.mxu0 }
 0x109   :  { %v995_v30 = vpop.f32.mrf.mxu1 }
 0x10a   :  { %v974_v31 = vpop.f32.mrf.mxu0 }
 0x10b   :  { %v996_v32 = vpop.f32.mrf.mxu1  ;;  %v975_v37 = vadd.f32 %v974_v31, %v973_v29 }
 0x10c   :  { %v976_v33 = vpop.f32.mrf.mxu0  ;;  %v997_v40 = vadd.f32 %v996_v32, %v995_v30 }
 0x10d   :  { %v998_v34 = vpop.f32.mrf.mxu1  ;;  %v647_v39 = vadd.f32 %v975_v37, %v883_v38 }
 0x10e   :  { %v977_v35 = vpop.f32.mrf.mxu0 }
 0x10f   :  { %v999_v36 = vpop.f32.mrf.mxu1  ;;  %v687_v45 = vadd.f32 %v997_v40, %v647_v39 }
 0x128   :  { %v1017_v41 = vpop.f32.mrf.mxu0 }
 0x129   :  { %v1039_v42 = vpop.f32.mrf.mxu1 }
 0x12a   :  { %v1018_v43 = vpop.f32.mrf.mxu0 }
 0x12b   :  { %v1040_v44 = vpop.f32.mrf.mxu1  ;;  %v1019_v46 = vadd.f32 %v1018_v43, %v1017_v41 }
 0x12c   :  { %v1020_v47 = vpop.f32.mrf.mxu0  ;;  %v1041_v50 = vadd.f32 %v1040_v44, %v1039_v42 }
 0x12d   :  { %v1042_v48 = vpop.f32.mrf.mxu1  ;;  %v727_v49 = vadd.f32 %v1019_v46, %v687_v45 }
 0x12e   :  { %v1021_v51 = vpop.f32.mrf.mxu0 }
 0x12f   :  { %v1043_v52 = vpop.f32.mrf.mxu1  ;;  %v767_v53 = vadd.f32 %v1041_v50, %v727_v49 }
 0x131   :  { %v772_v54 = vmax.f32 %v767_v53, 0.0 }
 0x133   :  { %1095 = vmatmul.mubr.f32.vlgmr.msra.gmra.mxu0 %v772_v54 }
 0x1f3   :  { %v862_v56 = vpop.f32.mrf.mxu0 }
 0x1f4   :  { %v863_v57 = vadd.f32 %v956_v55, %v862_v56 }
 0x1f5   :  { %v1096_v58 = vpop.f32.mrf.mxu0 }
 0x1f6   :  { %866 = vst [vmem:[#allocation8] sm:$0xff] %v863_v57 }
 0x1f7   :  { %1250 = shalt.err (!%p1247_p5)
}
 0x1f8   :  { %876 = dma.vmem_to_hbm [thread:$0]  %s874_s13, 128, %s1328_s5, [#allocation4]  }
 0x1f9   :  { %1263 = dma.done.wait [#allocation4], 128  }
 0x1fa   :  { %1264 = vsyncadd [#allocation4], 4294967168 }
 0x1fb   :  { %880 = vsyncpa [#allocation3], 1 }
 0x1fc   :  { %881 = vsyncpa [#allocation6], 1 }
 0x1fd   :  { %882 = vsyncpa [#allocation4], 1 }

</bundles_post_ra>
